<compile_context>
chip_gen: v5e
topology: v5e:2x2
jax: 0.10.0
libtpu: 0.0.40
codegen_flags: <defaults>
</compile_context>

<pallas_src>
import math
import functools

import jax
import jax.numpy as jnp
from jax.experimental import pallas as pl
from jax.experimental.pallas import tpu as pltpu


# --------------------------------------------------------------------------
# Fused MHAtt kernel: one grid step = one batch element, all heads.
# --------------------------------------------------------------------------
def _mhatt_kernel(q_ref, k_ref, v_ref, mask_ref,
                  wq_ref, bq_ref, wk_ref, bk_ref, wv_ref, bv_ref,
                  wm_ref, bm_ref, o_ref, *, num_heads):
    x_q = q_ref[0]            # (S, Cin)
    x_k = k_ref[0]            # (S, Cin)
    x_v = v_ref[0]            # (S, Cin)
    m = mask_ref[0]           # (1, S) int32, nonzero = masked out

    # Fused projections (one full-width MXU matmul each).  The 1/sqrt(d_k)
    # scale is already folded into wq/bq by prepare_params().
    qp = jnp.dot(x_q, wq_ref[...], preferred_element_type=jnp.float32) + bq_ref[...]
    kp = jnp.dot(x_k, wk_ref[...], preferred_element_type=jnp.float32) + bk_ref[...]
    vp = jnp.dot(x_v, wv_ref[...], preferred_element_type=jnp.float32) + bv_ref[...]

    s_len, c = qp.shape
    dh = c // num_heads
    nt_dims = (((1,), (1,)), ((), ()))      # contract last dims: q @ k^T, no transpose

    masked = m != 0                          # (1, S), broadcasts over query rows

    head_outs = []
    for h in range(num_heads):               # heads packed in lanes; static slices
        lo, hi = h * dh, (h + 1) * dh
        qh = qp[:, lo:hi]                    # (S, Dh)
        kh = kp[:, lo:hi]
        vh = vp[:, lo:hi]

        scores = jax.lax.dot_general(
            qh, kh, nt_dims, preferred_element_type=jnp.float32)       # (S, S)
        scores = jnp.where(masked, jnp.float32(-1000000000.0), scores)

        # numerically-stable softmax along the key axis
        scores = scores - jnp.max(scores, axis=-1, keepdims=True)
        p = jnp.exp(scores)
        p = p * pl.reciprocal(jnp.sum(p, axis=-1, keepdims=True), approx=True)

        # dropout_rate = 0 -> identity (module default)
        head_outs.append(jnp.dot(p, vh, preferred_element_type=jnp.float32))

    # Re-pack heads into the lane axis -> lane-dense (S, C) slab, then a single
    # full-width merge matmul and a lane-dense store.
    atted = jnp.concatenate(head_outs, axis=-1)                          # (S, C)
    o_ref[0] = (
        jnp.dot(atted, wm_ref[...], preferred_element_type=jnp.float32)
        + bm_ref[...]
    )


# --------------------------------------------------------------------------
# Parameter prep (one-time): fold attention scale into Q projection, shape
# biases to (1, C) so the kernel sees 2-D blocks.
# --------------------------------------------------------------------------
def prepare_params(params, split_num):
    dh = params["wq"].shape[1] // split_num
    scale = jnp.float32(1.0 / math.sqrt(dh))
    p = dict(params)
    p["wq"] = params["wq"] * scale
    p["bq"] = params["bq"] * scale
    for name in ("bq", "bk", "bv", "bm"):
        p[name] = p[name].reshape(1, -1)
    return p


# --------------------------------------------------------------------------
# Forward wrapper: single pallas_call, grid over batch ("parallel").
# --------------------------------------------------------------------------
def mhatt_forward(params, v, k, q, mask, split_num):
    """params must come from prepare_params(); v,k,q: (B,S,Cin); mask: (B,1,1,S)."""
    B, S, Cin = q.shape
    Cout = params["wq"].shape[1]

    mask_i = mask.reshape(B, 1, S).astype(jnp.int32)   # nonzero = masked out

    act_spec = pl.BlockSpec((1, S, Cin), lambda b: (b, 0, 0))
    mask_spec = pl.BlockSpec((1, 1, S), lambda b: (b, 0, 0))
    bias_spec = pl.BlockSpec((1, Cout), lambda b: (0, 0))
    out_spec = pl.BlockSpec((1, S, Cout), lambda b: (b, 0, 0))

    def w_spec(d_in):
        return pl.BlockSpec((d_in, Cout), lambda b: (0, 0))

    kernel = functools.partial(_mhatt_kernel, num_heads=split_num)

    return pl.pallas_call(
        kernel,
        out_shape=jax.ShapeDtypeStruct((B, S, Cout), jnp.float32),
        grid=(B,),
        in_specs=[
            act_spec, act_spec, act_spec, mask_spec,
            w_spec(Cin), bias_spec,     # q projection (scale pre-folded)
            w_spec(Cin), bias_spec,     # k projection
            w_spec(Cin), bias_spec,     # v projection
            w_spec(Cout), bias_spec,    # merge projection
        ],
        out_specs=out_spec,
        compiler_params=pltpu.CompilerParams(
            dimension_semantics=("parallel",)),
    )(q, k, v, mask_i,
      params["wq"], params["bq"],
      params["wk"], params["bk"],
      params["wv"], params["bv"],
      params["wm"], params["bm"])


# --------------------------------------------------------------------------
# Pure-JAX reference (mirrors the PyTorch module exactly)
# --------------------------------------------------------------------------
def mhatt_reference(params, v, k, q, mask, split_num):
    B, S, _ = q.shape
    out_ch = params["wq"].shape[1]
    dh = out_ch // split_num

    def project(x, w, b):
        y = x @ w + b
        return jnp.transpose(y.reshape(B, S, split_num, dh), (0, 2, 1, 3))

    vh = project(v, params["wv"], params["bv"])
    kh = project(k, params["wk"], params["bk"])
    qh = project(q, params["wq"], params["bq"])
    scores = jnp.einsum("bhqd,bhkd->bhqk", qh, kh) / math.sqrt(dh)
    scores = jnp.where(mask, -1000000000.0, scores)
    p = jax.nn.softmax(scores, axis=-1)
    atted = jnp.einsum("bhqk,bhkd->bhqd", p, vh)
    atted = jnp.transpose(atted, (0, 2, 1, 3)).reshape(B, S, out_ch)
    return atted @ params["wm"] + params["bm"]


if __name__ == "__main__":
    # Small shapes consistent with the module: in_channels=32, out_channels=32,
    # split_num=4 (head dim 8), batch=2, seq=8.
    B, S = 2, 8
    in_ch, out_ch, split_num = 32, 32, 4

    key = jax.random.PRNGKey(0)
    keys = jax.random.split(key, 12)

    def linear_init(kw, kb, fan_in, fan_out):
        bound = 1.0 / math.sqrt(fan_in)
        w = jax.random.uniform(kw, (fan_in, fan_out), jnp.float32, -bound, bound)
        b = jax.random.uniform(kb, (fan_out,), jnp.float32, -bound, bound)
        return w, b

    wv, bv = linear_init(keys[0], keys[1], in_ch, out_ch)
    wk, bk = linear_init(keys[2], keys[3], in_ch, out_ch)
    wq, bq = linear_init(keys[4], keys[5], in_ch, out_ch)
    wm, bm = linear_init(keys[6], keys[7], in_ch, out_ch)
    params = dict(wv=wv, bv=bv, wk=wk, bk=bk, wq=wq, bq=bq, wm=wm, bm=bm)

    v = jax.random.normal(keys[8], (B, S, in_ch), jnp.float32)
    k = jax.random.normal(keys[9], (B, S, in_ch), jnp.float32)
    q = jax.random.normal(keys[10], (B, S, in_ch), jnp.float32)
    # mask: True = position masked out; mask out the last 2 keys of batch 1.
    mask = jnp.zeros((B, 1, 1, S), dtype=bool).at[1, 0, 0, -2:].set(True)

    prepped = prepare_params(params, split_num)
    fwd = jax.jit(functools.partial(mhatt_forward, split_num=split_num))
    out = fwd(prepped, v, k, q, mask)
    jax.block_until_ready(out)

    ref = mhatt_reference(params, v, k, q, mask, split_num)
    assert out.shape == (B, S, out_ch)
    # Tolerance accommodates the EUP approximate reciprocal in the softmax
    # denominator (pl.reciprocal(approx=True)); structural errors would be >>1e-2.
    assert jnp.allclose(out, ref, atol=1e-2, rtol=1e-2), (
        float(jnp.max(jnp.abs(out - ref))))

    print("KERNEL_OK")
</pallas_src>

<mosaic_0001>
module attributes {stable_mosaic.version = 11 : i64} {
  func.func @_mhatt_kernel(%arg0: i32, %arg1: memref<1x8x32xf32, #tpu.memory_space<vmem>>, %arg2: memref<1x8x32xf32, #tpu.memory_space<vmem>>, %arg3: memref<1x8x32xf32, #tpu.memory_space<vmem>>, %arg4: memref<1x1x8xi32, #tpu.memory_space<vmem>>, %arg5: memref<32x32xf32, #tpu.memory_space<vmem>>, %arg6: memref<1x32xf32, #tpu.memory_space<vmem>>, %arg7: memref<32x32xf32, #tpu.memory_space<vmem>>, %arg8: memref<1x32xf32, #tpu.memory_space<vmem>>, %arg9: memref<32x32xf32, #tpu.memory_space<vmem>>, %arg10: memref<1x32xf32, #tpu.memory_space<vmem>>, %arg11: memref<32x32xf32, #tpu.memory_space<vmem>>, %arg12: memref<1x32xf32, #tpu.memory_space<vmem>>, %arg13: memref<1x8x32xf32, #tpu.memory_space<vmem>>) attributes {dimension_semantics = [#tpu.dimension_semantics<parallel>], iteration_bounds = array<i64: 2>, scalar_prefetch = 0 : i64, scratch_operands = 0 : i64, tpu.core_type = #tpu.core_type<tc>, window_params = [{transform_indices = @transform_0, window_bounds = array<i64: 1, 8, 32>}, {transform_indices = @transform_1, window_bounds = array<i64: 1, 8, 32>}, {transform_indices = @transform_2, window_bounds = array<i64: 1, 8, 32>}, {transform_indices = @transform_3, window_bounds = array<i64: 1, 1, 8>}, {pipeline_mode = #tpu.pipeline_mode<synchronous>, transform_indices = @transform_4, window_bounds = array<i64: 32, 32>}, {pipeline_mode = #tpu.pipeline_mode<synchronous>, transform_indices = @transform_5, window_bounds = array<i64: 1, 32>}, {pipeline_mode = #tpu.pipeline_mode<synchronous>, transform_indices = @transform_6, window_bounds = array<i64: 32, 32>}, {pipeline_mode = #tpu.pipeline_mode<synchronous>, transform_indices = @transform_7, window_bounds = array<i64: 1, 32>}, {pipeline_mode = #tpu.pipeline_mode<synchronous>, transform_indices = @transform_8, window_bounds = array<i64: 32, 32>}, {pipeline_mode = #tpu.pipeline_mode<synchronous>, transform_indices = @transform_9, window_bounds = array<i64: 1, 32>}, {pipeline_mode = #tpu.pipeline_mode<synchronous>, transform_indices = @transform_10, window_bounds = array<i64: 32, 32>}, {pipeline_mode = #tpu.pipeline_mode<synchronous>, transform_indices = @transform_11, window_bounds = array<i64: 1, 32>}, {transform_indices = @transform_12, window_bounds = array<i64: 1, 8, 32>}]} {
    %c0 = arith.constant 0 : index
    %c0_0 = arith.constant 0 : index
    %c0_1 = arith.constant 0 : index
    %0 = vector.load %arg1[%c0, %c0_0, %c0_1] : memref<1x8x32xf32, #tpu.memory_space<vmem>>, vector<1x8x32xf32>
    %1 = vector.shape_cast %0 : vector<1x8x32xf32> to vector<8x32xf32>
    %c0_2 = arith.constant 0 : index
    %c0_3 = arith.constant 0 : index
    %c0_4 = arith.constant 0 : index
    %2 = vector.load %arg2[%c0_2, %c0_3, %c0_4] : memref<1x8x32xf32, #tpu.memory_space<vmem>>, vector<1x8x32xf32>
    %3 = vector.shape_cast %2 : vector<1x8x32xf32> to vector<8x32xf32>
    %c0_5 = arith.constant 0 : index
    %c0_6 = arith.constant 0 : index
    %c0_7 = arith.constant 0 : index
    %4 = vector.load %arg3[%c0_5, %c0_6, %c0_7] : memref<1x8x32xf32, #tpu.memory_space<vmem>>, vector<1x8x32xf32>
    %5 = vector.shape_cast %4 : vector<1x8x32xf32> to vector<8x32xf32>
    %c0_8 = arith.constant 0 : index
    %c0_9 = arith.constant 0 : index
    %c0_10 = arith.constant 0 : index
    %6 = vector.load %arg4[%c0_8, %c0_9, %c0_10] : memref<1x1x8xi32, #tpu.memory_space<vmem>>, vector<1x1x8xi32>
    %7 = vector.shape_cast %6 : vector<1x1x8xi32> to vector<1x8xi32>
    %c0_11 = arith.constant 0 : index
    %c0_12 = arith.constant 0 : index
    %8 = vector.load %arg5[%c0_11, %c0_12] : memref<32x32xf32, #tpu.memory_space<vmem>>, vector<32x32xf32>
    %cst = arith.constant dense<0.000000e+00> : vector<8x32xf32>
    %9 = tpu.matmul %1, %8, %cst {dimension_numbers = #tpu.dot_dimension_numbers<[1], [0], [0], [1], [0, 0, 1, 1], [], []>} : vector<8x32xf32>, vector<32x32xf32>, vector<8x32xf32> -> vector<8x32xf32>
    %c0_13 = arith.constant 0 : index
    %c0_14 = arith.constant 0 : index
    %10 = vector.load %arg6[%c0_13, %c0_14] : memref<1x32xf32, #tpu.memory_space<vmem>>, vector<1x32xf32>
    %11 = vector.broadcast %10 : vector<1x32xf32> to vector<8x32xf32>
    %12 = arith.addf %9, %11 : vector<8x32xf32>
    %c0_15 = arith.constant 0 : index
    %c0_16 = arith.constant 0 : index
    %13 = vector.load %arg7[%c0_15, %c0_16] : memref<32x32xf32, #tpu.memory_space<vmem>>, vector<32x32xf32>
    %cst_17 = arith.constant dense<0.000000e+00> : vector<8x32xf32>
    %14 = tpu.matmul %3, %13, %cst_17 {dimension_numbers = #tpu.dot_dimension_numbers<[1], [0], [0], [1], [0, 0, 1, 1], [], []>} : vector<8x32xf32>, vector<32x32xf32>, vector<8x32xf32> -> vector<8x32xf32>
    %c0_18 = arith.constant 0 : index
    %c0_19 = arith.constant 0 : index
    %15 = vector.load %arg8[%c0_18, %c0_19] : memref<1x32xf32, #tpu.memory_space<vmem>>, vector<1x32xf32>
    %16 = vector.broadcast %15 : vector<1x32xf32> to vector<8x32xf32>
    %17 = arith.addf %14, %16 : vector<8x32xf32>
    %c0_20 = arith.constant 0 : index
    %c0_21 = arith.constant 0 : index
    %18 = vector.load %arg9[%c0_20, %c0_21] : memref<32x32xf32, #tpu.memory_space<vmem>>, vector<32x32xf32>
    %cst_22 = arith.constant dense<0.000000e+00> : vector<8x32xf32>
    %19 = tpu.matmul %5, %18, %cst_22 {dimension_numbers = #tpu.dot_dimension_numbers<[1], [0], [0], [1], [0, 0, 1, 1], [], []>} : vector<8x32xf32>, vector<32x32xf32>, vector<8x32xf32> -> vector<8x32xf32>
    %c0_23 = arith.constant 0 : index
    %c0_24 = arith.constant 0 : index
    %20 = vector.load %arg10[%c0_23, %c0_24] : memref<1x32xf32, #tpu.memory_space<vmem>>, vector<1x32xf32>
    %21 = vector.broadcast %20 : vector<1x32xf32> to vector<8x32xf32>
    %22 = arith.addf %19, %21 : vector<8x32xf32>
    %c0_i32 = arith.constant 0 : i32
    %23 = vector.broadcast %c0_i32 : i32 to vector<1x8xi32>
    %24 = arith.cmpi ne, %7, %23 : vector<1x8xi32>
    %25 = vector.extract_strided_slice %12 {offsets = [0, 0], sizes = [8, 8], strides = [1, 1]} : vector<8x32xf32> to vector<8x8xf32>
    %26 = vector.extract_strided_slice %17 {offsets = [0, 0], sizes = [8, 8], strides = [1, 1]} : vector<8x32xf32> to vector<8x8xf32>
    %27 = vector.extract_strided_slice %22 {offsets = [0, 0], sizes = [8, 8], strides = [1, 1]} : vector<8x32xf32> to vector<8x8xf32>
    %cst_25 = arith.constant dense<0.000000e+00> : vector<8x8xf32>
    %28 = tpu.matmul %25, %26, %cst_25 {dimension_numbers = #tpu.dot_dimension_numbers<[1], [1], [0], [0], [0, 0, 1, 0], [], []>} : vector<8x8xf32>, vector<8x8xf32>, vector<8x8xf32> -> vector<8x8xf32>
    %cst_26 = arith.constant -1.000000e+09 : f32
    %29 = vector.shape_cast %24 : vector<1x8xi1> to vector<1x8xi1>
    %30 = vector.broadcast %29 : vector<1x8xi1> to vector<8x8xi1>
    %31 = vector.broadcast %cst_26 : f32 to vector<8x8xf32>
    %32 = arith.select %30, %31, %28 : vector<8x8xi1>, vector<8x8xf32>
    %cst_27 = arith.constant dense<0xFF800000> : vector<8xf32>
    %33 = vector.multi_reduction <maximumf>, %32, %cst_27 [1] : vector<8x8xf32> to vector<8xf32>
    %34 = vector.shape_cast %33 : vector<8xf32> to vector<8x1xf32>
    %35 = vector.broadcast %34 : vector<8x1xf32> to vector<8x8xf32>
    %36 = arith.subf %32, %35 : vector<8x8xf32>
    %37 = math.exp %36 : vector<8x8xf32>
    %cst_28 = arith.constant dense<0.000000e+00> : vector<8xf32>
    %38 = vector.multi_reduction <add>, %37, %cst_28 [1] : vector<8x8xf32> to vector<8xf32>
    %39 = vector.shape_cast %38 : vector<8xf32> to vector<8x1xf32>
    %40 = tpu.reciprocal %39 {approx = true} : vector<8x1xf32> -> vector<8x1xf32>
    %41 = vector.broadcast %40 : vector<8x1xf32> to vector<8x8xf32>
    %42 = arith.mulf %37, %41 : vector<8x8xf32>
    %cst_29 = arith.constant dense<0.000000e+00> : vector<8x8xf32>
    %43 = tpu.matmul %42, %27, %cst_29 {dimension_numbers = #tpu.dot_dimension_numbers<[1], [0], [0], [1], [0, 0, 1, 1], [], []>} : vector<8x8xf32>, vector<8x8xf32>, vector<8x8xf32> -> vector<8x8xf32>
    %44 = vector.extract_strided_slice %12 {offsets = [0, 8], sizes = [8, 8], strides = [1, 1]} : vector<8x32xf32> to vector<8x8xf32>
    %45 = vector.extract_strided_slice %17 {offsets = [0, 8], sizes = [8, 8], strides = [1, 1]} : vector<8x32xf32> to vector<8x8xf32>
    %46 = vector.extract_strided_slice %22 {offsets = [0, 8], sizes = [8, 8], strides = [1, 1]} : vector<8x32xf32> to vector<8x8xf32>
    %cst_30 = arith.constant dense<0.000000e+00> : vector<8x8xf32>
    %47 = tpu.matmul %44, %45, %cst_30 {dimension_numbers = #tpu.dot_dimension_numbers<[1], [1], [0], [0], [0, 0, 1, 0], [], []>} : vector<8x8xf32>, vector<8x8xf32>, vector<8x8xf32> -> vector<8x8xf32>
    %cst_31 = arith.constant -1.000000e+09 : f32
    %48 = vector.shape_cast %24 : vector<1x8xi1> to vector<1x8xi1>
    %49 = vector.broadcast %48 : vector<1x8xi1> to vector<8x8xi1>
    %50 = vector.broadcast %cst_31 : f32 to vector<8x8xf32>
    %51 = arith.select %49, %50, %47 : vector<8x8xi1>, vector<8x8xf32>
    %cst_32 = arith.constant dense<0xFF800000> : vector<8xf32>
    %52 = vector.multi_reduction <maximumf>, %51, %cst_32 [1] : vector<8x8xf32> to vector<8xf32>
    %53 = vector.shape_cast %52 : vector<8xf32> to vector<8x1xf32>
    %54 = vector.broadcast %53 : vector<8x1xf32> to vector<8x8xf32>
    %55 = arith.subf %51, %54 : vector<8x8xf32>
    %56 = math.exp %55 : vector<8x8xf32>
    %cst_33 = arith.constant dense<0.000000e+00> : vector<8xf32>
    %57 = vector.multi_reduction <add>, %56, %cst_33 [1] : vector<8x8xf32> to vector<8xf32>
    %58 = vector.shape_cast %57 : vector<8xf32> to vector<8x1xf32>
    %59 = tpu.reciprocal %58 {approx = true} : vector<8x1xf32> -> vector<8x1xf32>
    %60 = vector.broadcast %59 : vector<8x1xf32> to vector<8x8xf32>
    %61 = arith.mulf %56, %60 : vector<8x8xf32>
    %cst_34 = arith.constant dense<0.000000e+00> : vector<8x8xf32>
    %62 = tpu.matmul %61, %46, %cst_34 {dimension_numbers = #tpu.dot_dimension_numbers<[1], [0], [0], [1], [0, 0, 1, 1], [], []>} : vector<8x8xf32>, vector<8x8xf32>, vector<8x8xf32> -> vector<8x8xf32>
    %63 = vector.extract_strided_slice %12 {offsets = [0, 16], sizes = [8, 8], strides = [1, 1]} : vector<8x32xf32> to vector<8x8xf32>
    %64 = vector.extract_strided_slice %17 {offsets = [0, 16], sizes = [8, 8], strides = [1, 1]} : vector<8x32xf32> to vector<8x8xf32>
    %65 = vector.extract_strided_slice %22 {offsets = [0, 16], sizes = [8, 8], strides = [1, 1]} : vector<8x32xf32> to vector<8x8xf32>
    %cst_35 = arith.constant dense<0.000000e+00> : vector<8x8xf32>
    %66 = tpu.matmul %63, %64, %cst_35 {dimension_numbers = #tpu.dot_dimension_numbers<[1], [1], [0], [0], [0, 0, 1, 0], [], []>} : vector<8x8xf32>, vector<8x8xf32>, vector<8x8xf32> -> vector<8x8xf32>
    %cst_36 = arith.constant -1.000000e+09 : f32
    %67 = vector.shape_cast %24 : vector<1x8xi1> to vector<1x8xi1>
    %68 = vector.broadcast %67 : vector<1x8xi1> to vector<8x8xi1>
    %69 = vector.broadcast %cst_36 : f32 to vector<8x8xf32>
    %70 = arith.select %68, %69, %66 : vector<8x8xi1>, vector<8x8xf32>
    %cst_37 = arith.constant dense<0xFF800000> : vector<8xf32>
    %71 = vector.multi_reduction <maximumf>, %70, %cst_37 [1] : vector<8x8xf32> to vector<8xf32>
    %72 = vector.shape_cast %71 : vector<8xf32> to vector<8x1xf32>
    %73 = vector.broadcast %72 : vector<8x1xf32> to vector<8x8xf32>
    %74 = arith.subf %70, %73 : vector<8x8xf32>
    %75 = math.exp %74 : vector<8x8xf32>
    %cst_38 = arith.constant dense<0.000000e+00> : vector<8xf32>
    %76 = vector.multi_reduction <add>, %75, %cst_38 [1] : vector<8x8xf32> to vector<8xf32>
    %77 = vector.shape_cast %76 : vector<8xf32> to vector<8x1xf32>
    %78 = tpu.reciprocal %77 {approx = true} : vector<8x1xf32> -> vector<8x1xf32>
    %79 = vector.broadcast %78 : vector<8x1xf32> to vector<8x8xf32>
    %80 = arith.mulf %75, %79 : vector<8x8xf32>
    %cst_39 = arith.constant dense<0.000000e+00> : vector<8x8xf32>
    %81 = tpu.matmul %80, %65, %cst_39 {dimension_numbers = #tpu.dot_dimension_numbers<[1], [0], [0], [1], [0, 0, 1, 1], [], []>} : vector<8x8xf32>, vector<8x8xf32>, vector<8x8xf32> -> vector<8x8xf32>
    %82 = vector.extract_strided_slice %12 {offsets = [0, 24], sizes = [8, 8], strides = [1, 1]} : vector<8x32xf32> to vector<8x8xf32>
    %83 = vector.extract_strided_slice %17 {offsets = [0, 24], sizes = [8, 8], strides = [1, 1]} : vector<8x32xf32> to vector<8x8xf32>
    %84 = vector.extract_strided_slice %22 {offsets = [0, 24], sizes = [8, 8], strides = [1, 1]} : vector<8x32xf32> to vector<8x8xf32>
    %cst_40 = arith.constant dense<0.000000e+00> : vector<8x8xf32>
    %85 = tpu.matmul %82, %83, %cst_40 {dimension_numbers = #tpu.dot_dimension_numbers<[1], [1], [0], [0], [0, 0, 1, 0], [], []>} : vector<8x8xf32>, vector<8x8xf32>, vector<8x8xf32> -> vector<8x8xf32>
    %cst_41 = arith.constant -1.000000e+09 : f32
    %86 = vector.shape_cast %24 : vector<1x8xi1> to vector<1x8xi1>
    %87 = vector.broadcast %86 : vector<1x8xi1> to vector<8x8xi1>
    %88 = vector.broadcast %cst_41 : f32 to vector<8x8xf32>
    %89 = arith.select %87, %88, %85 : vector<8x8xi1>, vector<8x8xf32>
    %cst_42 = arith.constant dense<0xFF800000> : vector<8xf32>
    %90 = vector.multi_reduction <maximumf>, %89, %cst_42 [1] : vector<8x8xf32> to vector<8xf32>
    %91 = vector.shape_cast %90 : vector<8xf32> to vector<8x1xf32>
    %92 = vector.broadcast %91 : vector<8x1xf32> to vector<8x8xf32>
    %93 = arith.subf %89, %92 : vector<8x8xf32>
    %94 = math.exp %93 : vector<8x8xf32>
    %cst_43 = arith.constant dense<0.000000e+00> : vector<8xf32>
    %95 = vector.multi_reduction <add>, %94, %cst_43 [1] : vector<8x8xf32> to vector<8xf32>
    %96 = vector.shape_cast %95 : vector<8xf32> to vector<8x1xf32>
    %97 = tpu.reciprocal %96 {approx = true} : vector<8x1xf32> -> vector<8x1xf32>
    %98 = vector.broadcast %97 : vector<8x1xf32> to vector<8x8xf32>
    %99 = arith.mulf %94, %98 : vector<8x8xf32>
    %cst_44 = arith.constant dense<0.000000e+00> : vector<8x8xf32>
    %100 = tpu.matmul %99, %84, %cst_44 {dimension_numbers = #tpu.dot_dimension_numbers<[1], [0], [0], [1], [0, 0, 1, 1], [], []>} : vector<8x8xf32>, vector<8x8xf32>, vector<8x8xf32> -> vector<8x8xf32>
    %101 = tpu.concatenate %43, %62, %81, %100 in 1 : vector<8x8xf32>, vector<8x8xf32>, vector<8x8xf32>, vector<8x8xf32> -> vector<8x32xf32>
    %c0_45 = arith.constant 0 : index
    %c0_46 = arith.constant 0 : index
    %102 = vector.load %arg11[%c0_45, %c0_46] : memref<32x32xf32, #tpu.memory_space<vmem>>, vector<32x32xf32>
    %cst_47 = arith.constant dense<0.000000e+00> : vector<8x32xf32>
    %103 = tpu.matmul %101, %102, %cst_47 {dimension_numbers = #tpu.dot_dimension_numbers<[1], [0], [0], [1], [0, 0, 1, 1], [], []>} : vector<8x32xf32>, vector<32x32xf32>, vector<8x32xf32> -> vector<8x32xf32>
    %c0_48 = arith.constant 0 : index
    %c0_49 = arith.constant 0 : index
    %104 = vector.load %arg12[%c0_48, %c0_49] : memref<1x32xf32, #tpu.memory_space<vmem>>, vector<1x32xf32>
    %105 = vector.broadcast %104 : vector<1x32xf32> to vector<8x32xf32>
    %106 = arith.addf %103, %105 : vector<8x32xf32>
    %c0_50 = arith.constant 0 : index
    %c0_51 = arith.constant 0 : index
    %c0_52 = arith.constant 0 : index
    %107 = vector.load %arg13[%c0_50, %c0_51, %c0_52] : memref<1x8x32xf32, #tpu.memory_space<vmem>>, vector<1x8x32xf32>
    %108 = vector.shape_cast %107 : vector<1x8x32xf32> to vector<8x32xf32>
    %109 = vector.shape_cast %106 : vector<8x32xf32> to vector<1x8x32xf32>
    tpu.vector_store %arg13[%c0_50, %c0_51, %c0_52], %109 {strides = array<i32>} : memref<1x8x32xf32, #tpu.memory_space<vmem>>, vector<1x8x32xf32>,
    return
  }
  func.func @transform_0(%arg0: i32) -> (i32, i32, i32) {
    %c0_i32 = arith.constant 0 : i32
    %c0_i32_0 = arith.constant 0 : i32
    %c0_i32_1 = arith.constant 0 : i32
    return %arg0, %c0_i32, %c0_i32_0 : i32, i32, i32
  }
  func.func @transform_1(%arg0: i32) -> (i32, i32, i32) {
    %c0_i32 = arith.constant 0 : i32
    %c0_i32_0 = arith.constant 0 : i32
    %c0_i32_1 = arith.constant 0 : i32
    return %arg0, %c0_i32, %c0_i32_0 : i32, i32, i32
  }
  func.func @transform_2(%arg0: i32) -> (i32, i32, i32) {
    %c0_i32 = arith.constant 0 : i32
    %c0_i32_0 = arith.constant 0 : i32
    %c0_i32_1 = arith.constant 0 : i32
    return %arg0, %c0_i32, %c0_i32_0 : i32, i32, i32
  }
  func.func @transform_3(%arg0: i32) -> (i32, i32, i32) {
    %c0_i32 = arith.constant 0 : i32
    %c0_i32_0 = arith.constant 0 : i32
    %c0_i32_1 = arith.constant 0 : i32
    return %arg0, %c0_i32, %c0_i32_0 : i32, i32, i32
  }
  func.func @transform_4(%arg0: i32) -> (i32, i32) {
    %c0_i32 = arith.constant 0 : i32
    %c0_i32_0 = arith.constant 0 : i32
    %c0_i32_1 = arith.constant 0 : i32
    return %c0_i32, %c0_i32_0 : i32, i32
  }
  func.func @transform_5(%arg0: i32) -> (i32, i32) {
    %c0_i32 = arith.constant 0 : i32
    %c0_i32_0 = arith.constant 0 : i32
    %c0_i32_1 = arith.constant 0 : i32
    return %c0_i32, %c0_i32_0 : i32, i32
  }
  func.func @transform_6(%arg0: i32) -> (i32, i32) {
    %c0_i32 = arith.constant 0 : i32
    %c0_i32_0 = arith.constant 0 : i32
    %c0_i32_1 = arith.constant 0 : i32
    return %c0_i32, %c0_i32_0 : i32, i32
  }
  func.func @transform_7(%arg0: i32) -> (i32, i32) {
    %c0_i32 = arith.constant 0 : i32
    %c0_i32_0 = arith.constant 0 : i32
    %c0_i32_1 = arith.constant 0 : i32
    return %c0_i32, %c0_i32_0 : i32, i32
  }
  func.func @transform_8(%arg0: i32) -> (i32, i32) {
    %c0_i32 = arith.constant 0 : i32
    %c0_i32_0 = arith.constant 0 : i32
    %c0_i32_1 = arith.constant 0 : i32
    return %c0_i32, %c0_i32_0 : i32, i32
  }
  func.func @transform_9(%arg0: i32) -> (i32, i32) {
    %c0_i32 = arith.constant 0 : i32
    %c0_i32_0 = arith.constant 0 : i32
    %c0_i32_1 = arith.constant 0 : i32
    return %c0_i32, %c0_i32_0 : i32, i32
  }
  func.func @transform_10(%arg0: i32) -> (i32, i32) {
    %c0_i32 = arith.constant 0 : i32
    %c0_i32_0 = arith.constant 0 : i32
    %c0_i32_1 = arith.constant 0 : i32
    return %c0_i32, %c0_i32_0 : i32, i32
  }
  func.func @transform_11(%arg0: i32) -> (i32, i32) {
    %c0_i32 = arith.constant 0 : i32
    %c0_i32_0 = arith.constant 0 : i32
    %c0_i32_1 = arith.constant 0 : i32
    return %c0_i32, %c0_i32_0 : i32, i32
  }
  func.func @transform_12(%arg0: i32) -> (i32, i32, i32) {
    %c0_i32 = arith.constant 0 : i32
    %c0_i32_0 = arith.constant 0 : i32
    %c0_i32_1 = arith.constant 0 : i32
    return %arg0, %c0_i32, %c0_i32_0 : i32, i32, i32
  }
}

</mosaic_0001>

<bundles_post_ra>
// kernel: mhatt_forward.1
= control target key start
LH: loop header
LB: loop body
LE: loop exit
PB: predicated region body
PF: predicated region fallthrough
CT: control target
= control target key end

     0   :  { %s2010_s0 = inlined_call_operand.hbm [shape: f32[2,8,32], index: 0, kind: input, shape index: {}]   ;;  %s2011_s1 = inlined_call_operand.hbm [shape: f32[2,8,32], index: 1, kind: input, shape index: {}]   ;;  %s2012_s2 = inlined_call_operand.hbm [shape: f32[2,8,32], index: 2, kind: input, shape index: {}]   ;;  %s2013_s3 = inlined_call_operand.vmem [shape: s32[2,1,8], index: 3, kind: input, shape index: {}]   ;;  %s2014_s4 = inlined_call_operand.hbm [shape: f32[32,32], index: 4, kind: input, shape index: {}]   ;;  %s2015_s5 = inlined_call_operand.vmem [shape: f32[1,32], index: 5, kind: input, shape index: {}]   ;;  %s2016_s6 = inlined_call_operand.hbm [shape: f32[32,32], index: 6, kind: input, shape index: {}]   ;;  %s2017_s7 = inlined_call_operand.vmem [shape: f32[1,32], index: 7, kind: input, shape index: {}]   ;;  %s2018_s8 = inlined_call_operand.hbm [shape: f32[32,32], index: 8, kind: input, shape index: {}]   ;;  %s2019_s9 = inlined_call_operand.vmem [shape: f32[1,32], index: 9, kind: input, shape index: {}]   ;;  %s2020_s10 = inlined_call_operand.hbm [shape: f32[32,32], index: 10, kind: input, shape index: {}]   ;;  %s2021_s11 = inlined_call_operand.vmem [shape: f32[1,32], index: 11, kind: input, shape index: {}]   ;;  %s2022_s12 = inlined_call_operand.hbm [shape: f32[2,8,32], index: 12, kind: output, shape index: {}]  }
   0x1   :  { %2036 = sst [smem:[#allocation26_spill]] %s2011_s1 }
   0x2   :  { %2037 = sst [smem:[#allocation27_spill]] %s2014_s4 }
   0x3   :  { %2038 = sst [smem:[#allocation28_spill]] %s2016_s6 }
   0x4   :  { %2039 = sst [smem:[#allocation29_spill]] %s2018_s8 }
   0x5   :  { %2040 = sst [smem:[#allocation30_spill]] %s2020_s10 }
   0x6   :  { %2041 = sst [smem:[#allocation31_spill]] %s2021_s11 }
   0x7   :  { %17 = vsyncpa [#allocation3], 0 }
   0x8   :  { %19 = vsyncpa [#allocation3 + $0x1], 0 }
   0x9   :  { %20 = vsyncpa [#allocation6], 0 }
   0xa   :  { %22 = vsyncpa [#allocation6 + $0x1], 0 }
   0xb   :  { %23 = vsyncpa [#allocation9], 0 }
   0xc   :  { %24 = vsyncpa [#allocation12], 0 }
   0xd   :  { %25 = vsyncpa [#allocation4], 0 }
   0xe   :  { %27 = vsyncpa [#allocation4 + $0x1], 0  ;;  %s1710_s21 = smov 0   ;;  %s1712_s22 = smov 0  }
   0xf   :  { %s1714_s23 = smov 0   ;;  %s1716_s24 = smov 0  }
  0x10 LB: > { %2042 = sst [smem:[#allocation20_spill]] %s1618_s21  ;;  %s1734_s28 = sadd.s32 4294967295, %s1630_s24   ;;  %s1630_s24 = sphi %s1716_s24, %s2074_s24   ;;  %s1626_s23 = sphi %s1714_s23, %s2078_s23   ;;  %s1622_s22 = sphi %s1712_s22, %s2077_s22   ;;  %s1618_s21 = sphi %s1710_s21, %s2076_s21  }
  0x11   : > { %2043 = sst [smem:[#allocation21_spill]] %s1630_s24  ;;  %p1175_p0 = scmp.ge.s32.totalorder %s1630_s24, 1 }
  0x12   : > { %s2044_s4 = sld [smem:[#allocation27_spill]]  ;;  %p2033_p1 = scmp.eq.s32.totalorder %s1734_s28, 0 }
  0x13   : > { %p336_p2 = scmp.lt.s32.totalorder %s1630_s24, 3  ;;  %s1632_s30 = smov [#allocation8]  }
  0x14   : > { %s349_s13 = sshll.u32 %s1632_s30, 4  ;;  %s2046_s8 = sld [smem:[#allocation29_spill]]  ;;  %s350_s13 = int_to_ptr.vmem [resolvable:$true] %s349_s13 }
  0x15   : > { %p1739_p3 = pnand %p1175_p0, %p336_p2  ;;  %s1633_s18 = smov [#allocation11]  }
  0x16   : > { %s383_s19 = sshll.u32 %s1633_s18, 4  ;;  %s2023_s20 = smov 128   ;;  %s384_s19 = int_to_ptr.vmem [resolvable:$true] %s383_s19 }
  0x17   : > { %p1240_p4 = pneg %p1739_p3  ;;  %s2025_s25 = smov 8  }
  0x18   : > { %s347_s27 = sshll.u32 %s2044_s4, 4  ;;  %s1174_s26 = sadd.s32 4294967294, %s1630_s24   ;;  %s348_s27 = int_to_ptr.hbm [resolvable:$true] %s347_s27 }
  0x19   : > { %p1751_p6 = pnand %p1240_p4, %p2033_p1  ;;  %s1767_s30 = sadd.s32 1, %s1630_s24  }
  0x1a   : > { %s381_s16 = sshll.u32 %s2046_s8, 4  ;;  %2048 = sst [smem:[#allocation22_spill]] %s1767_s30  ;;  %s382_s16 = int_to_ptr.hbm [resolvable:$true] %s381_s16 }
  0x1b   : > { %1243 = dma.hbm_to_vmem [thread:$0]  (!%p1751_p6), %s348_s27, 512, %s350_s13, [#allocation9], %s2023_s20, %s2023_s20, %s2025_s25  }
  0x1c   : > { %1249 = dma.hbm_to_vmem [thread:$0]  (!%p1751_p6), %s382_s16, 512, %s384_s19, [#allocation12], %s2023_s20, %s2023_s20, %s2025_s25  }
  0x1d   : > { %s37_s14 = ssub.s32 %s1630_s24, %s1767_s30  ;;  %s40_s15 = sadd.s32 1, %s1626_s23 }
  0x1e   : > { %p38_p7 = scmp.eq.s32.totalorder %s37_s14, 0  ;;  %p47_p8 = scmp.ne.s32.totalorder %s1626_s23, %s1622_s22 }
  0x1f   : > { %p48_p9 = scmp.eq.s32.totalorder %s1630_s24, 0  ;;  %p53_p10 = scmp.ne.s32.totalorder %s1622_s22, %s1618_s21 }
  0x20   : > { %s1778_s27 = scalar_select %p38_p7, %s1626_s23, %s40_s15  }
  0x21   : > { %p49_p11 = por %p48_p9, %p47_p8  ;;  %p1782_p12 = por %p2033_p1, %p53_p10 }
  0x22   : > { %2049 = sst [smem:[#allocation23_spill]] %s1778_s27  ;;  %p323_p13 = scmp.eq.s32.totalorder %s1734_s28, 1 }
  0x23   : > { %p329_p0 = scmp.eq.s32.totalorder %s1174_s26, 1  ;;  %p1271_p2 = scmp.lt.s32.totalorder %s1630_s24, 2 }
  0x24   : > { %s2030_s16 = sand.u32 1, %s1626_s23   ;;  %p1789_p4 = por %p323_p13, %p47_p8 }
  0x25   : > { %p1793_p5 = por %p329_p0, %p53_p10  ;;  %s1799_s14 = sshll.u32 %s2030_s16, 3 }
  0x26   : > { %s2051_s18 = scalar_select %p1789_p4, 1, 0 }
  0x27   : > { %s2053_s19 = scalar_select %p1793_p5, 1, 0 }
  0x28   : > { %2052 = sst [smem:[#allocation24_spill]] %s2051_s18  ;;  %s1802_s15 = sshll.u32 %s1630_s24, 3 }
  0x29   : > { %2054 = sst [smem:[#allocation25_spill]] %s2053_s19  ;;  %p1804_p7 = pnand %p1271_p2, %p49_p11 }
  0x2a   : > { %s436_s26 = sand.u32 1, %s1630_s24   ;;  %s2056_s1 = sld [smem:[#allocation26_spill]] }
  0x2b   : > { %s440_s30 = scalar_lea.vmem [#allocation5], %s1799_s14  ;;  %s1814_s16 = scalar_lea.sflag [#allocation6], %s436_s26 }
  0x2c   : > { %s448_s19 = sshll.u32 %s440_s30, 4  ;;  %p1406_p9 = pneg %p1804_p7  ;;  %s449_s19 = int_to_ptr.vmem [resolvable:$true] %s448_s19 }
  0x30   : > { %s444_s8 = scalar_lea.hbm %s2056_s1, %s1802_s15 }
  0x31   : > { %s446_s27 = sshll.u32 %s444_s8, 4  ;;  %s1409_s8 = scalar_lea.hbm %s2056_s1, 16  ;;  %s447_s27 = int_to_ptr.hbm [resolvable:$true] %s446_s27 }
  0x32   : > { %s1402_s21 = sshra.s32 %s447_s27, 4  ;;  %s1403_s21 = int_to_ptr.hbm [resolvable:$true] %s1402_s21 }
  0x33   : > { %s1404_s11 = scalar_lea.hbm %s1403_s21, 8  ;;  %p1410_p13 = scmp.lt.s32.totalorder %s1403_s21, %s2056_s1 }
  0x34   : > { %p1405_p8 = scmp.ne.s32.totalorder %s1403_s21, %s1404_s11  ;;  %p1411_p0 = scmp.lt.s32.totalorder %s1409_s8, %s1404_s11 }
  0x36   : > { %p1407_p10 = pnand %p1406_p9, %p1405_p8  ;;  %p1412_p2 = por %p1411_p0, %p1410_p13 }
  0x38   : > { %p1408_p11 = pneg %p1407_p10 }
  0x3a   : > { %p1413_p1 = pnand %p1412_p2, %p1408_p11 }
  0x3c   : > { %1416 = shalt.err (!%p1413_p1)
}
  0x3d   : > { %1259 = dma.hbm_to_vmem [thread:$0]  (!%p1804_p7), %s447_s27, 128, %s449_s19, %s1814_s16  }
  0x3e   : > { %s2057_s6 = sld [smem:[#allocation28_spill]]  ;;  %s1636_s4 = smov [#allocation10]  }
  0x3f   : > { %s366_s21 = sshll.u32 %s1636_s4, 4  ;;  %s2058_s10 = sld [smem:[#allocation30_spill]]  ;;  %s367_s21 = int_to_ptr.vmem [resolvable:$true] %s366_s21 }
  0x40   : > { %s2059_s30 = smov 8   ;;  %s2060_s1 = smov 128  }
  0x41   : > { %s1637_s27 = smov [#allocation13]   ;;  %s425_s4 = scalar_lea.hbm %s2010_s0, %s1802_s15 }
  0x42   : > { %s400_s19 = sshll.u32 %s1637_s27, 4  ;;  %s421_s11 = scalar_lea.vmem [#allocation2], %s1799_s14  ;;  %s401_s19 = int_to_ptr.vmem [resolvable:$true] %s400_s19 }
  0x43   : > { %s429_s8 = sshll.u32 %s421_s11, 4  ;;  %s430_s8 = int_to_ptr.vmem [resolvable:$true] %s429_s8 }
  0x44   : > { %s364_s24 = sshll.u32 %s2057_s6, 4  ;;  %s427_s6 = sshll.u32 %s425_s4, 4  ;;  %s365_s24 = int_to_ptr.hbm [resolvable:$true] %s364_s24  ;;  %s428_s6 = int_to_ptr.hbm [resolvable:$true] %s427_s6 }
  0x45   : > { %s398_s25 = sshll.u32 %s2058_s10, 4  ;;  %s1492_s10 = sshra.s32 %s428_s6, 4  ;;  %s399_s25 = int_to_ptr.hbm [resolvable:$true] %s398_s25  ;;  %s1493_s10 = int_to_ptr.hbm [resolvable:$true] %s1492_s10 }
  0x46   : > { %1246 = dma.hbm_to_vmem [thread:$0]  (!%p1751_p6), %s365_s24, 512, %s367_s21, [#allocation9], %s2060_s1, %s2060_s1, %s2059_s30  }
  0x47   : > { %1252 = dma.hbm_to_vmem [thread:$0]  (!%p1751_p6), %s399_s25, 512, %s401_s19, [#allocation12], %s2060_s1, %s2060_s1, %s2059_s30  }
  0x48   : > { %s2061_s24 = sand.u32 1, %s1626_s23   ;;  %s1494_s27 = scalar_lea.hbm %s1493_s10, 8 }
  0x49   : > { %s418_s21 = scalar_lea.sflag [#allocation3], %s2061_s24  ;;  %p1495_p1 = scmp.ne.s32.totalorder %s1493_s10, %s1494_s27 }
  0x4a   : > { %s1499_s25 = scalar_lea.hbm %s2010_s0, 16  ;;  %p1500_p6 = scmp.lt.s32.totalorder %s1493_s10, %s2010_s0 }
  0x4b   : > { %p1497_p8 = pnand %p1495_p1, %p1406_p9  ;;  %p1501_p11 = scmp.lt.s32.totalorder %s1499_s25, %s1494_s27 }
  0x4d   : > { %p1498_p10 = pneg %p1497_p8  ;;  %p1502_p13 = por %p1501_p11, %p1500_p6 }
  0x4f   : > { %p1503_p0 = pnand %p1502_p13, %p1498_p10 }
  0x51   : > { %1506 = shalt.err (!%p1503_p0)
}
  0x52   : > { %1256 = dma.hbm_to_vmem [thread:$0]  (!%p1804_p7), %s428_s6, 128, %s430_s8, %s418_s21  }
  0x53   : > { %s463_s4 = scalar_lea.hbm %s2012_s2, %s1802_s15  ;;  %s459_s11 = scalar_lea.vmem [#allocation7], %s1799_s14 }
  0x54   : > { %s467_s24 = sshll.u32 %s459_s11, 4  ;;  %s465_s1 = sshll.u32 %s463_s4, 4  ;;  %s468_s24 = int_to_ptr.vmem [resolvable:$true] %s467_s24  ;;  %s466_s1 = int_to_ptr.hbm [resolvable:$true] %s465_s1 }
  0x55   : > { %s1522_s10 = sshra.s32 %s466_s1, 4  ;;  %s1529_s6 = scalar_lea.hbm %s2012_s2, 16  ;;  %s1523_s10 = int_to_ptr.hbm [resolvable:$true] %s1522_s10 }
  0x56   : > { %s1524_s27 = scalar_lea.hbm %s1523_s10, 8  ;;  %p1530_p10 = scmp.lt.s32.totalorder %s1523_s10, %s2012_s2 }
  0x57   : > { %p1525_p2 = scmp.ne.s32.totalorder %s1523_s10, %s1524_s27  ;;  %p1531_p6 = scmp.lt.s32.totalorder %s1529_s6, %s1524_s27 }
  0x59   : > { %p1527_p1 = pnand %p1525_p2, %p1406_p9  ;;  %p1532_p11 = por %p1531_p6, %p1530_p10 }
  0x5b   : > { %p1528_p8 = pneg %p1527_p1 }
  0x5d   : > { %p1533_p13 = pnand %p1532_p11, %p1528_p8 }
  0x5f   : > { %1536 = shalt.err (!%p1533_p13)
}
  0x60   : > { %1262 = dma.hbm_to_vmem [thread:$0]  (!%p1804_p7), %s466_s1, 128, %s468_s24, %s1814_s16  }
  0x61   : > { %482 = sbr.rel (%p1739_p3) target bundleno = 1149 (0x47d), region = 68  ;;  %s1884_s14 = sand.u32 (!%p1739_p3), 1, %s1622_s22  }
  0x62   : > { %s1887_s15 = sshll.u32 (!%p1739_p3), %s1884_s14, 3  ;;  %s485_s30 = scalar_lea.sflag (!%p1739_p3), [#allocation3], %s1884_s14 }
  0x63   : > { %s488_s19 = scalar_lea.vmem (!%p1739_p3), [#allocation2], %s1887_s15 }
  0x66   : > { %1597 = dma.done.wait (%p1782_p12), %s485_s30, 128  }
  0x67   : > { %1599 = vsyncadd (%p1782_p12), %s485_s30, 4294967168  ;;  %s494_s29 = sand.u32 1, %s1734_s28   ;;  %s498_s16 = scalar_lea.vmem [#allocation5], %s1887_s15 }
  0x68   : > { %s495_s20 = scalar_lea.sflag [#allocation6], %s494_s29 }
  0x69   : > { %1601 = dma.done.wait (%p1782_p12), %s495_s20, 256  }
  0x6a   : > { %1603 = vsyncadd (%p1782_p12), %s495_s20, 4294967040  ;;  %s508_s18 = scalar_lea.vmem [#allocation7], %s1887_s15  ;;  %p2062_p3 = scmp.eq.s32.totalorder %s1734_s28, 0 }
  0x6c   : > { %1605 = dma.done.wait (%p2062_p3), [#allocation9], 1024   ;;  %p2063_p7 = pmov %p2062_p3 }
  0x6d   : > { %p2064_p9 = pmov %p2062_p3 }
  0x6e   : > { %1607 = vsyncadd (%p2063_p7), [#allocation9], 4294966272 }
  0x6f   : > { %1609 = dma.done.wait (%p2064_p9), [#allocation12], 1024   ;;  %p2065_p0 = pmov %p2062_p3 }
  0x70   : > { %v625_v0 = vld [vmem:[#allocation10 + $0x18] sm:$0xff]  ;;  %v624_v1 = vld [vmem:[#allocation10 + $0x10] sm:$0xff]  ;;  %v623_v4 = vld [vmem:[#allocation10 + $0x8] sm:$0xff]  ;;  %vm598_vm0 = vcmask 261120   ;;  %vm685_vm1 = vcmask 64512   ;;  %s1638_s24 = smov 104  }
  0x71   : > { %1611 = vsyncadd (%p2065_p0), [#allocation12], 4294966272  ;;  %v593_v2 = vld [vmem:[#allocation8 + $0x18] sm:$0xff]  ;;  %645 = vmatpush.msra.mxu1 %v625_v0  ;;  %v592_v3 = vld [vmem:[#allocation8 + $0x10] sm:$0xff]  ;;  %s1639_s1 = smov 120   ;;  %s1640_s10 = smov 112  }
  0x72   : > { %614 = vmatpush.msra.mxu0 %v593_v2  ;;  %v591_v5 = vld [vmem:[#allocation8 + $0x8] sm:$0xff]  ;;  %v622_v6 = vld [vmem:[#allocation10] sm:$0xff]  ;;  %v586_v9 = vld [vmem:[%s488_s19] sm:$0xff]  ;;  %p583_p12 = scmp.lt.s32.totalorder %s1734_s28, 1  ;;  %v1641_v27 = vmov 0   ;;  %s1642_s30 = smov 16  }
  0x73   : > { %646 = vmatpush.msra.mxu1 %v624_v1  ;;  %v590_v7 = vld [vmem:[#allocation8] sm:$0xff]  ;;  %v1322_v10 = vld [vmem:[%s2017_s7] ss:$0 sm:$0xff]  ;;  %v656_v16 = vld [vmem:[#allocation11 + $0x18] sm:$0xff]  ;;  %s1643_s19 = smov 8   ;;  %s1644_s29 = smov 24  }
  0x74   : > { %615 = vmatpush.msra.mxu0 %v592_v3  ;;  %v587_v8 = vld [vmem:[%s498_s16] sm:$0xff]  ;;  %v1323_v11 = vld [vmem:[%s2015_s5] ss:$0 sm:$0xff]  ;;  %676 = vmatpush.msra.mxu2 %v656_v16  ;;  %s584_s27 = scalar_select %p583_p12, %s1734_s28, 1  ;;  %vm962_vm4 = vcmask 130048   ;;  %vm964_vm5 = vcmask 195584  }
  0x75   : > { %647 = vmatpush.msra.mxu1 %v623_v4  ;;  %v655_v17 = vld [vmem:[#allocation11 + $0x10] sm:$0xff]  ;;  %v654_v18 = vld [vmem:[#allocation11 + $0x8] sm:$0xff]  ;;  %v653_v19 = vld [vmem:[#allocation11] sm:$0xff]  ;;  %s1213_s20 = sshll.u32 %s1734_s28, 3  ;;  %s999_s17 = scalar_lea.sflag [#allocation4], %s1884_s14 }
  0x76   : > { %616 = vmatpush.msra.mxu0 %v591_v5  ;;  %677 = vmatpush.msra.mxu2 %v655_v17  ;;  %v588_v20 = vld [vmem:[%s508_s18] sm:$0xff]  ;;  %s585_s6 = scalar_lea.vmem %s2013_s3, %s584_s27  ;;  %s1009_s26 = scalar_lea.hbm %s2022_s12, %s1213_s20 }
  0x77   : > { %648 = vmatpush.msra.mxu1 %v622_v6  ;;  %v589_v24 = vld [vmem:[%s585_s6] sm:$0x1]  ;;  %s1013_s27 = sshll.u32 %s1009_s26, 4  ;;  %s1014_s27 = int_to_ptr.hbm [resolvable:$true] %s1013_s27 }
  0x78   : > { %617 = vmatpush.msra.mxu0 %v590_v7  ;;  %1197 = vmatmul.msk.f32.vlgmr.msra.gmra.mxu1 %vm598_vm0, %v587_v8  ;;  %vm684_vm2 = vcmp.ne.s32.totalorder %v589_v24, 0  ;;  %v1324_v35 = vld [vmem:[%s2019_s9] ss:$0 sm:$0xff]  ;;  %v967_v24 = vld [vmem:[#allocation13 + $0x8] sm:$0xff]  ;;  %s1566_s28 = sshra.s32 %s1014_s27, 4  ;;  %s1567_s28 = int_to_ptr.hbm [resolvable:$true] %s1566_s28 }
  0x79   : > { %1196 = vmatmul.msk.f32.vlgmr.msra.gmra.mxu0 %vm598_vm0, %v586_v9  ;;  %678 = vmatpush.msra.mxu2 %v654_v18  ;;  %v712_v28 = vsel %vm684_vm2, 1, %v1641_v27  ;;  %s1568_s25 = scalar_lea.hbm %s1567_s28, 8  ;;  %p1573_p10 = scmp.lt.s32.totalorder %s1567_s28, %s2022_s12 }
  0x7a   : > { %v713_v29 = vperm.slane %v712_v28, 0  ;;  %p1569_p2 = scmp.ne.s32.totalorder %s1567_s28, %s1568_s25 }
  0x7b   : > { %679 = vmatpush.msra.mxu2 %v653_v19 }
  0x7c   : > { %1198 = vmatmul.msk.f32.vlgmr.msra.gmra.mxu2 %vm598_vm0, %v588_v20  ;;  %vm1940_vm3 = vcmp.eq.s32.totalorder %v713_v29, 1  ;;  %p1570_p1 = pnand %p1569_p2, %p1789_p4 }
  0x7e   : > { %p1571_p8 = pneg %p1570_p1 }
  0xf5   : > { %v650_v12 = vpop.f32.mrf.mxu1 }
  0xf6   : > { %v619_v13 = vpop.f32.mrf.mxu0  ;;  %v651_v14 = vadd.f32 %v1322_v10, %v650_v12 }
  0xf7   : > { %v620_v15 = vadd.f32 %v1323_v11, %v619_v13 }
  0xf8   : > { %885 = vrot.lane.b32.xlu2 %v651_v14, %s1638_s24  ;;  %752 = vrot.lane.b32.xlu1 %v651_v14, %s1639_s1 }
  0xf9   : > { %819 = vrot.lane.b32.xlu0 %v651_v14, %s1640_s10  ;;  %1199 = vmatpush.xpose.msk.msra.mxu3 %vm685_vm1, %v651_v14 }
  0xfc   : > { %1200 = vmatmul.msk.f32.vlgmr.msra.gmra.mxu3 %vm685_vm1, %v620_v15 }
  0xff   : > { %v681_v36 = vpop.f32.mrf.mxu2 }
 0x100   : > { %883 = vrot.lane.b32.xlu2 %v620_v15, %s1638_s24  ;;  %750 = vrot.lane.b32.xlu1 %v620_v15, %s1639_s1  ;;  %v682_v37 = vadd.f32 %v1324_v35, %v681_v36 }
 0x101   : > { %817 = vrot.lane.b32.xlu0 %v620_v15, %s1640_s10 }
 0x102   : > { %745 = vmatpush.msrb.mxu3 %v682_v37 }
 0x152   : > { %v886_v22 = vpop.permute.xlu2 %885 }
 0x15a   : > { %v884_v30 = vpop.permute.xlu2 %883 }
 0x16a   : > { %v753_v21 = vpop.permute.xlu1 %752 }
 0x16b   : > { %v820_v23 = vpop.permute.xlu0 %819  ;;  %1202 = vmatpush.xpose.msk.msrb.mxu0 %vm685_vm1, %v753_v21 }
 0x16c   : > { %1205 = vmatpush.xpose.msk.msrb.mxu2 %vm685_vm1, %v820_v23  ;;  %v968_v23 = vld [vmem:[#allocation13 + $0x10] sm:$0xff] }
 0x16f   : > { %1208 = vmatpush.xpose.msk.msra.mxu0 %vm685_vm1, %v886_v22  ;;  %v969_v22 = vld [vmem:[#allocation13 + $0x18] sm:$0xff] }
 0x170   : > { %989 = vmatpush.msra.mxu2 %v969_v22 }
 0x172   : > { %v751_v25 = vpop.permute.xlu1 %750  ;;  %990 = vmatpush.msra.mxu2 %v968_v23 }
 0x173   : > { %v818_v26 = vpop.permute.xlu0 %817  ;;  %1203 = vmatmul.msk.f32.vlgmr.msrb.gmra.mxu0 %vm685_vm1, %v751_v25  ;;  %v966_v25 = vld [vmem:[#allocation13] sm:$0xff] }
 0x174   : > { %1206 = vmatmul.msk.f32.vlgmr.msrb.gmra.mxu2 %vm685_vm1, %v818_v26 }
 0x175   : > { %991 = vmatpush.msra.mxu2 %v967_v24 }
 0x177   : > { %992 = vmatpush.msra.mxu2 %v966_v25 }
 0x17b   : > { %1209 = vmatmul.msk.f32.vlgmr.msra.gmra.mxu0 %vm685_vm1, %v884_v30 }
 0x17f   : > { %v709_v32 = vpop.f32.mrf.mxu3 }
 0x180   : > { %v715_v33 = vsel %vm1940_vm3, -1e+09, %v709_v32 }
 0x181   : > { %v716_v34 = vsel %vm685_vm1, %v715_v33, -inf }
 0x182   : > { %717 = vmax.xlane.f32.xlu0 %v716_v34 }
 0x1f0   : > { %v775_v38 = vpop.f32.mrf.mxu0 }
 0x1f1   : > { %v778_v39 = vsel %vm1940_vm3, -1e+09, %v775_v38 }
 0x1f2   : > { %v779_v40 = vsel %vm685_vm1, %v778_v39, -inf }
 0x1f3   : > { %780 = vmax.xlane.f32.xlu1 %v779_v40 }
 0x1f5   : > { %v718_v41 = vpop.xlane.xlu0 %717 }
 0x1f6   : > { %v719_v42 = vsub.f32 %v715_v33, %v718_v41 }
 0x1f7   : > { %v842_v43 = vpop.f32.mrf.mxu2 }
 0x1f8   : > { %v720_v44 = vmul.f32 1.442695, %v719_v42  ;;  %v845_v45 = vsel %vm1940_vm3, -1e+09, %v842_v43  ;;  %v908_v47 = vpop.f32.mrf.mxu0 }
 0x1f9   : > { %v846_v46 = vsel %vm685_vm1, %v845_v45, -inf  ;;  %v911_v48 = vsel %vm1940_vm3, -1e+09, %v908_v47 }
 0x1fa   : > { %1326 = vpow2.f32 %v720_v44  ;;  %847 = vmax.xlane.f32.xlu2 %v846_v46  ;;  %v912_v50 = vsel %vm685_vm1, %v911_v48, -inf }
 0x200   : > { %v1327_v49 = vpop.eup %1326 }
 0x201   : > { %v722_v51 = vsel %vm685_vm1, %v1327_v49, 0.0 }
 0x202   : > { %913 = vmax.xlane.f32.xlu2 %v912_v50  ;;  %723 = vadd.xlane.f32.xlu0 %v722_v51 }
 0x266   : > { %v781_v52 = vpop.xlane.xlu1 %780 }
 0x267   : > { %v782_v53 = vsub.f32 %v778_v39, %v781_v52 }
 0x269   : > { %v783_v54 = vmul.f32 1.442695, %v782_v53 }
 0x26b   : > { %1328 = vpow2.f32 %v783_v54 }
 0x26d   : > { %v848_v55 = vpop.xlane.xlu2 %847 }
 0x26e   : > { %v849_v56 = vsub.f32 %v845_v45, %v848_v55 }
 0x270   : > { %v850_v57 = vmul.f32 1.442695, %v849_v56 }
 0x271   : > { %v1329_v58 = vpop.eup %1328 }
 0x272   : > { %1330 = vpow2.f32 %v850_v57  ;;  %v785_v59 = vsel %vm685_vm1, %v1329_v58, 0.0 }
 0x273   : > { %786 = vadd.xlane.f32.xlu1 %v785_v59 }
 0x275   : > { %v914_v60 = vpop.xlane.xlu2 %913  ;;  %v724_v61 = vpop.xlane.xlu0 %723 }
 0x276   : > { %v915_v62 = vsub.f32 %v911_v48, %v914_v60  ;;  %1332 = vrcp.f32 %v724_v61 }
 0x278   : > { %v1331_v63 = vpop.eup %1330  ;;  %v916_v0 = vmul.f32 1.442695, %v915_v62 }
 0x279   : > { %v852_v1 = vsel %vm685_vm1, %v1331_v63, 0.0 }
 0x27a   : > { %1334 = vpow2.f32 %v916_v0  ;;  %853 = vadd.xlane.f32.xlu2 %v852_v1 }
 0x27c   : > { %v1333_v2 = vpop.eup %1332 }
 0x27d   : > { %v726_v3 = vmul.f32 %v1333_v2, %v1327_v49 }
 0x27f   : > { %1201 = vmatmul.msk.f32.vlgmr.msrb.gmra.mxu3 %vm685_vm1, %v726_v3 }
 0x280   : > { %v1335_v4 = vpop.eup %1334 }
 0x281   : > { %v918_v5 = vsel %vm685_vm1, %v1335_v4, 0.0 }
 0x282   : > { %919 = vadd.xlane.f32.xlu0 %v918_v5 }
 0x28c   : > { %791 = vrot.lane.b32.xlu1 %v682_v37, %s1639_s1  ;;  %s582_s1 = scalar_lea.vmem [#allocation14], %s1887_s15  ;;  %s1572_s15 = scalar_lea.hbm %s2022_s12, 16 }
 0x28d   : > { %p1574_p6 = scmp.lt.s32.totalorder %s1572_s15, %s1568_s25 }
 0x28f   : > { %p1575_p11 = por %p1574_p6, %p1573_p10 }
 0x291   : > { %p1576_p13 = pnand %p1575_p11, %p1571_p8 }
 0x292   : > { %857 = vrot.lane.b32.xlu2 %v682_v37, %s1640_s10  ;;  %s1011_s10 = sshll.u32 %s582_s1, 4  ;;  %s1012_s10 = int_to_ptr.vmem [resolvable:$true] %s1011_s10 }
 0x296   : > { %923 = vrot.lane.b32.xlu0 %v682_v37, %s1638_s24  ;;  %s2069_s24 = sld [smem:[#allocation31_spill]] }
 0x29c   : > { %v1325_v32 = vld [vmem:[%s2069_s24] ss:$0 sm:$0xff] }
 0x2e6   : > { %v787_v7 = vpop.xlane.xlu1 %786 }
 0x2ed   : > { %v854_v6 = vpop.xlane.xlu2 %853 }
 0x2ee   : > { %1336 = vrcp.f32 %v854_v6 }
 0x2ef   : > { %1338 = vrcp.f32 %v787_v7 }
 0x2f4   : > { %v1337_v8 = vpop.eup %1336 }
 0x2f5   : > { %v856_v9 = vmul.f32 %v1337_v8, %v1331_v63  ;;  %v858_v10 = vpop.permute.xlu2 %857  ;;  %v1339_v11 = vpop.eup %1338 }
 0x2f6   : > { %878 = vmatpush.msra.mxu3 %v858_v10  ;;  %v920_v12 = vpop.xlane.xlu0 %919  ;;  %v789_v14 = vmul.f32 %v1339_v11, %v1329_v58 }
 0x2f7   : > { %1207 = vmatmul.msk.f32.vlgmr.msra.gmra.mxu3 %vm685_vm1, %v856_v9  ;;  %1340 = vrcp.f32 %v920_v12 }
 0x2fd   : > { %v1341_v15 = vpop.eup %1340 }
 0x2fe   : > { %v792_v13 = vpop.permute.xlu1 %791  ;;  %v922_v16 = vmul.f32 %v1341_v15, %v1335_v4 }
 0x2ff   : > { %812 = vmatpush.msrb.mxu1 %v792_v13 }
 0x300   : > { %1204 = vmatmul.msk.f32.vlgmr.msrb.gmra.mxu1 %vm685_vm1, %v789_v14 }
 0x302   : > { %v747_v18 = vpop.f32.mrf.mxu3 }
 0x308   : > { %v924_v17 = vpop.permute.xlu0 %923 }
 0x309   : > { %944 = vmatpush.msra.mxu1 %v924_v17 }
 0x30a   : > { %1210 = vmatmul.msk.f32.vlgmr.msra.gmra.mxu1 %vm685_vm1, %v922_v16 }
 0x37a   : > { %v880_v19 = vpop.f32.mrf.mxu3 }
 0x37b   : > { %954 = vrot.lane.b32.xlu0 %v880_v19, %s1642_s30 }
 0x37d   : > { %v814_v20 = vpop.f32.mrf.mxu1 }
 0x37e   : > { %950 = vrot.lane.b32.xlu1 %v814_v20, %s1643_s19 }
 0x387   : > { %v946_v21 = vpop.f32.mrf.mxu1 }
 0x388   : > { %958 = vrot.lane.b32.xlu2 %v946_v21, %s1644_s29 }
 0x3e2   : > { %v959_v29 = vpop.permute.xlu2 %958 }
 0x3ed   : > { %v955_v27 = vpop.permute.xlu0 %954 }
 0x3f0   : > { %v951_v26 = vpop.permute.xlu1 %950 }
 0x3f1   : > { %v961_v28 = vsel %vm685_vm1, %v747_v18, %v951_v26 }
 0x3f2   : > { %v963_v30 = vsel %vm962_vm4, %v961_v28, %v955_v27 }
 0x3f3   : > { %v965_v31 = vsel %vm964_vm5, %v963_v30, %v959_v29 }
 0x3f4   : > { %1211 = vmatmul.msk.f32.vlgmr.msra.gmra.mxu2 %vm598_vm0, %v965_v31 }
 0x477   : > { %v994_v33 = vpop.f32.mrf.mxu2 }
 0x478   : > { %v995_v34 = vadd.f32 %v1325_v32, %v994_v33 }
 0x47a   : > { %997 = vst.msk [vmem:[%s582_s1] sm:$0xff] %vm598_vm0, %v995_v34 }
 0x47b   : > { %1579 = shalt.err (!%p1576_p13)
}
 0x47c   : > { %1238 = dma.vmem_to_hbm [thread:$0]  (%p1789_p4), %s1012_s10, 128, %s1014_s27, %s999_s17  }
 0x47d PF: > { %s2070_s14 = sld [smem:[#allocation20_spill]] }
 0x47e   : > { %s2072_s29 = sld [smem:[#allocation21_spill]] }
 0x483   : > { %s1025_s20 = sand.u32 1, %s2070_s14  }
 0x484   : > { %p2073_p3 = scmp.ge.s32.totalorder %s2072_s29, 2  ;;  %s1026_s16 = scalar_lea.sflag [#allocation4], %s1025_s20 }
 0x486   : > { %p1264_p7 = pnand %p2073_p3, %p1793_p5 }
 0x488   : > { %p1265_p9 = pneg %p1264_p7 }
 0x48a   : > { %1613 = dma.done.wait (%p1265_p9), %s1026_s16, 128  }
 0x48b   : > { %1615 = vsyncadd (%p1265_p9), %s1026_s16, 4294967168  ;;  %s2074_s24 = sld [smem:[#allocation22_spill]]  ;;  %s2076_s21 = smov %s1622_s22 }
 0x48c   : > { %s2075_s18 = sld [smem:[#allocation23_spill]]  ;;  %s2077_s22 = smov %s1626_s23 }
 0x491   : > { %p30_p0 = scmp.ge.s32.totalorder %s2074_s24, 4  }
 0x492   : > { %s2078_s23 = smov %s2075_s18 }
 0x493   :  { %32 = sbr.rel (!%p30_p0) target bundleno = 16 (0x10), region = 156 }
 0x498   :  { %1032 = vsyncpa [#allocation3], 1 }
 0x499   :  { %1034 = vsyncpa [#allocation3 + $0x1], 1 }
 0x49a   :  { %1035 = vsyncpa [#allocation6], 1 }
 0x49b   :  { %1037 = vsyncpa [#allocation6 + $0x1], 1 }
 0x49c   :  { %1038 = vsyncpa [#allocation9], 1 }
 0x49d   :  { %1039 = vsyncpa [#allocation12], 1 }
 0x49e   :  { %1040 = vsyncpa [#allocation4], 1 }
 0x49f   :  { %1042 = vsyncpa [#allocation4 + $0x1], 1 }

</bundles_post_ra>
